<compile_context>
chip_gen: v7x
topology: tpu7x:2x2x1
jax: 0.10.0
libtpu: 0.0.40
codegen_flags: <defaults>
</compile_context>

<pallas_src>
import jax
import jax.numpy as jnp
from jax.experimental import pallas as pl
from jax.experimental.pallas import tpu as pltpu


_LANE = 128
_SUBLANE_BY_ITEMSIZE = {4: 8, 2: 16, 1: 32}   # f32 / bf16 / int8-fp8 vreg tiling
_TARGET_TILE_BYTES = 2 * 1024 * 1024          # per-operand per-step tile budget
_VMEM_LIMIT_BYTES = 32 * 1024 * 1024          # explicit, safe on v5e/v6e/v7x


def _sublane_mult(dtype) -> int:
    return _SUBLANE_BY_ITEMSIZE.get(jnp.dtype(dtype).itemsize, 8)


def _pick_lane_width(total: int, max_lanes: int = 32768) -> int:
    """Largest multiple of 128 that divides `total`, capped at max_lanes (0 if none)."""
    for k in range(max_lanes // _LANE, 0, -1):
        lanes = k * _LANE
        if total % lanes == 0:
            return lanes
    return 0


# ---------------------------------------------------------------------------
# ADD: elementwise x[0] + x[1]
# ---------------------------------------------------------------------------
def _add_kernel(a_ref, b_ref, o_ref):
    o_ref[...] = a_ref[...] + b_ref[...]


def _combine_add(x0, x1):
    assert x0.shape == x1.shape and x0.dtype == x1.dtype
    orig_shape = x0.shape
    total = x0.size
    itemsize = jnp.dtype(x0.dtype).itemsize
    lanes = _pick_lane_width(total)

    if lanes == 0:
        # Ragged total (not a multiple of 128): single whole-array block
        # (block_shape == full dims is always layout-legal).
        a2d = x0.reshape(1, total)
        b2d = x1.reshape(1, total)
        out2d = pl.pallas_call(
            _add_kernel,
            out_shape=jax.ShapeDtypeStruct(a2d.shape, a2d.dtype),
        )(a2d, b2d)
        return out2d.reshape(orig_shape)

    rows = total // lanes
    sub = _sublane_mult(x0.dtype)

    # Rows per tile so one operand tile is ~_TARGET_TILE_BYTES (sublane-aligned).
    block_rows = max(sub, (_TARGET_TILE_BYTES // (lanes * itemsize)) // sub * sub)
    if block_rows >= rows:
        block_rows = rows                # full dim -> legal for any row count
        grid = (1,)
    else:
        grid = (pl.cdiv(rows, block_rows),)   # ragged tail masked by Pallas

    a2d = x0.reshape(rows, lanes)
    b2d = x1.reshape(rows, lanes)
    out2d = pl.pallas_call(
        _add_kernel,
        out_shape=jax.ShapeDtypeStruct((rows, lanes), x0.dtype),
        grid=grid,
        in_specs=[
            pl.BlockSpec((block_rows, lanes), lambda i: (i, 0)),
            pl.BlockSpec((block_rows, lanes), lambda i: (i, 0)),
        ],
        out_specs=pl.BlockSpec((block_rows, lanes), lambda i: (i, 0)),
        compiler_params=pltpu.CompilerParams(
            dimension_semantics=("parallel",),
            vmem_limit_bytes=_VMEM_LIMIT_BYTES,
        ),
    )(a2d, b2d)
    return out2d.reshape(orig_shape)


# ---------------------------------------------------------------------------
# CONCAT: torch.cat(x, dim=1)  (channel concat in NCHW), lane-dense layout
# ---------------------------------------------------------------------------
def _cat_kernel(a_ref, b_ref, o_ref):
    s0 = a_ref.shape[-1]
    o_ref[:, :s0] = a_ref[...]
    o_ref[:, s0:] = b_ref[...]


def _combine_cat(x0, x1):
    assert x0.shape[0] == x1.shape[0]
    assert x0.shape[2:] == x1.shape[2:]
    assert x0.dtype == x1.dtype
    N, C0 = x0.shape[0], x0.shape[1]
    C1 = x1.shape[1]
    spatial = x0.shape[2:]
    hw = 1
    for d in spatial:
        hw *= d
    s0, s1 = C0 * hw, C1 * hw
    st = s0 + s1
    itemsize = jnp.dtype(x0.dtype).itemsize
    sub = _sublane_mult(x0.dtype)

    a2d = x0.reshape(N, s0)
    b2d = x1.reshape(N, s1)

    # Batch rows per grid step so (read + write) per step is a few MiB.
    bytes_per_row = 2 * st * itemsize
    block_n = max(1, (2 * _TARGET_TILE_BYTES) // max(bytes_per_row, 1))
    if block_n >= N:
        block_n = N                      # full dim -> legal for any N
        grid = (1,)
    else:
        block_n = max(sub, (block_n // sub) * sub)   # sublane-aligned partial blocks
        if block_n >= N:
            block_n = N
            grid = (1,)
        else:
            grid = (pl.cdiv(N, block_n),)

    out2d = pl.pallas_call(
        _cat_kernel,
        out_shape=jax.ShapeDtypeStruct((N, st), x0.dtype),
        grid=grid,
        in_specs=[
            pl.BlockSpec((block_n, s0), lambda i: (i, 0)),
            pl.BlockSpec((block_n, s1), lambda i: (i, 0)),
        ],
        out_specs=pl.BlockSpec((block_n, st), lambda i: (i, 0)),
        compiler_params=pltpu.CompilerParams(
            dimension_semantics=("parallel",),
            vmem_limit_bytes=_VMEM_LIMIT_BYTES,
        ),
    )(a2d, b2d)
    return out2d.reshape((N, C0 + C1) + spatial)


# ---------------------------------------------------------------------------
# Combine wrapper (mirrors the PyTorch module)
# ---------------------------------------------------------------------------
def combine(xs, method: str = "ADD"):
    assert method in ("ADD", "CONCAT")
    if method == "ADD":
        return _combine_add(xs[0], xs[1])
    return _combine_cat(xs[0], xs[1])


if __name__ == "__main__":
    key = jax.random.PRNGKey(0)
    k0, k1 = jax.random.split(key)
    # Small NCHW inputs consistent with the module's channel-combine semantics.
    x0 = jax.random.normal(k0, (2, 4, 16, 16), dtype=jnp.float32)
    x1 = jax.random.normal(k1, (2, 4, 16, 16), dtype=jnp.float32)

    # ADD
    y_add = combine([x0, x1], method="ADD")
    jax.block_until_ready(y_add)
    ref_add = x0 + x1
    assert y_add.shape == (2, 4, 16, 16)
    assert jnp.allclose(y_add, ref_add, atol=1e-6), "ADD mismatch"

    # CONCAT
    y_cat = combine([x0, x1], method="CONCAT")
    jax.block_until_ready(y_cat)
    ref_cat = jnp.concatenate([x0, x1], axis=1)
    assert y_cat.shape == (2, 8, 16, 16)
    assert jnp.allclose(y_cat, ref_cat, atol=1e-6), "CONCAT mismatch"

    print("KERNEL_OK")
</pallas_src>

<mosaic_0001>
module attributes {stable_mosaic.version = 11 : i64} {
  func.func @_add_kernel(%arg0: i32, %arg1: memref<1x2048xf32, #tpu.memory_space<vmem>>, %arg2: memref<1x2048xf32, #tpu.memory_space<vmem>>, %arg3: memref<1x2048xf32, #tpu.memory_space<vmem>>) attributes {dimension_semantics = [#tpu.dimension_semantics<parallel>], iteration_bounds = array<i64: 1>, scalar_prefetch = 0 : i64, scratch_operands = 0 : i64, tpu.core_type = #tpu.core_type<tc>, window_params = [{transform_indices = @transform_0, window_bounds = array<i64: 1, 2048>}, {transform_indices = @transform_1, window_bounds = array<i64: 1, 2048>}, {transform_indices = @transform_2, window_bounds = array<i64: 1, 2048>}]} {
    %c0 = arith.constant 0 : index
    %c0_0 = arith.constant 0 : index
    %0 = vector.load %arg1[%c0, %c0_0] : memref<1x2048xf32, #tpu.memory_space<vmem>>, vector<1x2048xf32>
    %c0_1 = arith.constant 0 : index
    %c0_2 = arith.constant 0 : index
    %1 = vector.load %arg2[%c0_1, %c0_2] : memref<1x2048xf32, #tpu.memory_space<vmem>>, vector<1x2048xf32>
    %2 = arith.addf %0, %1 : vector<1x2048xf32>
    %c0_3 = arith.constant 0 : index
    %c0_4 = arith.constant 0 : index
    %3 = vector.load %arg3[%c0_3, %c0_4] : memref<1x2048xf32, #tpu.memory_space<vmem>>, vector<1x2048xf32>
    tpu.vector_store %arg3[%c0_3, %c0_4], %2 {strides = array<i32>} : memref<1x2048xf32, #tpu.memory_space<vmem>>, vector<1x2048xf32>,
    return
  }
  func.func @transform_0(%arg0: i32) -> (i32, i32) {
    %c0_i32 = arith.constant 0 : i32
    %c0_i32_0 = arith.constant 0 : i32
    return %arg0, %c0_i32 : i32, i32
  }
  func.func @transform_1(%arg0: i32) -> (i32, i32) {
    %c0_i32 = arith.constant 0 : i32
    %c0_i32_0 = arith.constant 0 : i32
    return %arg0, %c0_i32 : i32, i32
  }
  func.func @transform_2(%arg0: i32) -> (i32, i32) {
    %c0_i32 = arith.constant 0 : i32
    %c0_i32_0 = arith.constant 0 : i32
    return %arg0, %c0_i32 : i32, i32
  }
}

</mosaic_0001>

<bundles_post_ra>
// kernel: tpu_custom_call.1
= control target key start
LH: loop header
LB: loop body
LE: loop exit
PB: predicated region body
PF: predicated region fallthrough
CT: control target
= control target key end

     0   :  { %7 = vsyncpa [#allocation3], 0  ;;  %s189_s0 = inlined_call_operand.hbm [shape: f32[1,2048], index: 0, kind: input, shape index: {}]   ;;  %s190_s1 = inlined_call_operand.hbm [shape: f32[1,2048], index: 1, kind: input, shape index: {}]   ;;  %s191_s2 = inlined_call_operand.hbm [shape: f32[1,2048], index: 2, kind: output, shape index: {}]  }
   0x1   :  { %8 = vsyncpa [#allocation6], 0 }
   0x2   :  { %9 = vsyncpa [#allocation4], 0  ;;  %s135_s9 = smov [#allocation2]   ;;  %s136_s11 = smov [#allocation5]  }
   0x3   :  { %s16_s10 = sshll.u32 %s135_s9, 4  ;;  %s26_s12 = sshll.u32 %s136_s11, 4  ;;  %s17_s10 = int_to_ptr.vmem [resolvable:$true] %s16_s10  ;;  %s27_s12 = int_to_ptr.vmem [resolvable:$true] %s26_s12 }
   0x4   :  { %s63_s15 = scalar_lea.hbm %s189_s0, 256 }
   0x5   :  { %p64_p0 = scmp.ne.s32.totalorder %s189_s0, %s63_s15  ;;  %p67_p1 = scmp.lt.u32.totalorder %s63_s15, %s189_s0 }
   0x7   :  { %p69_p2 = pnand %p67_p1, %p64_p0 }
   0x9   :  { %72 = shalt.err (!%p69_p2)
}
   0xa   :  { %s73_s20 = scalar_lea.vmem %s17_s10, 256  ;;  %p78_p4 = scmp.lt.s32.totalorder %s17_s10, %s17_s10 }
   0xb   :  { %p74_p3 = scmp.ne.s32.totalorder %s17_s10, %s73_s20  ;;  %p79_p5 = scmp.lt.s32.totalorder %s73_s20, %s73_s20 }
   0xd   :  { %p80_p6 = por %p79_p5, %p78_p4 }
   0xf   :  { %p81_p7 = pnand %p80_p6, %p74_p3 }
  0x11   :  { %84 = shalt.err (!%p81_p7)
}
  0x12   :  { %19 = dma.hbm_to_vmem [thread:$0]  %s189_s0, 256, %s17_s10, [#allocation3]  }
  0x13   :  { %s85_s25 = scalar_lea.hbm %s190_s1, 256 }
  0x14   :  { %p86_p8 = scmp.ne.s32.totalorder %s190_s1, %s85_s25  ;;  %p89_p9 = scmp.lt.u32.totalorder %s85_s25, %s190_s1 }
  0x16   :  { %p91_p10 = pnand %p89_p9, %p86_p8 }
  0x18   :  { %94 = shalt.err (!%p91_p10)
}
  0x19   :  { %s95_s30 = scalar_lea.vmem %s27_s12, 256  ;;  %p100_p12 = scmp.lt.s32.totalorder %s27_s12, %s27_s12 }
  0x1a   :  { %p96_p11 = scmp.ne.s32.totalorder %s27_s12, %s95_s30  ;;  %p101_p13 = scmp.lt.s32.totalorder %s95_s30, %s95_s30 }
  0x1c   :  { %p102_p0 = por %p101_p13, %p100_p12 }
  0x1e   :  { %p103_p1 = pnand %p102_p0, %p96_p11 }
  0x20   :  { %106 = shalt.err (!%p103_p1)
}
  0x21   :  { %29 = dma.hbm_to_vmem [thread:$0]  %s190_s1, 256, %s27_s12, [#allocation6]  }
  0x22   :  { %129 = dma.done.wait [#allocation3], 256  }
  0x23   :  { %130 = vsyncadd [#allocation3], 4294967040 }
  0x24   :  { %131 = dma.done.wait [#allocation6], 256  }
  0x25   :  { %132 = vsyncadd [#allocation6], 4294967040  ;;  %s137_s4 = smov [#allocation7]   ;;  %v36_v0 = vld [vmem:[#allocation2] sm:$0xff]  ;;  %v38_v1 = vld [vmem:[#allocation5] sm:$0xff] }
  0x26   :  { %s50_s5 = sshll.u32 %s137_s4, 4  ;;  %v37_v2 = vld [vmem:[#allocation2 + $0x8] sm:$0xff]  ;;  %v40_v3 = vadd.f32 %v38_v1, %v36_v0  ;;  %v39_v4 = vld [vmem:[#allocation5 + $0x8] sm:$0xff]  ;;  %s51_s5 = int_to_ptr.vmem [resolvable:$true] %s50_s5 }
  0x27   :  { %v41_v5 = vadd.f32 %v39_v4, %v37_v2  ;;  %s107_s6 = scalar_lea.vmem %s51_s5, 256  ;;  %p112_p3 = scmp.lt.s32.totalorder %s51_s5, %s51_s5 }
  0x28   :  { %42 = vst [vmem:[#allocation7] sm:$0xff] %v40_v3  ;;  %p108_p2 = scmp.ne.s32.totalorder %s51_s5, %s107_s6  ;;  %p113_p4 = scmp.lt.s32.totalorder %s107_s6, %s107_s6 }
  0x29   :  { %43 = vst [vmem:[#allocation7 + $0x8] sm:$0xff] %v41_v5 }
  0x2a   :  { %p114_p5 = por %p113_p4, %p112_p3 }
  0x2c   :  { %p115_p6 = pnand %p114_p5, %p108_p2 }
  0x2e   :  { %118 = shalt.err (!%p115_p6)
}
  0x2f   :  { %s119_s8 = scalar_lea.hbm %s191_s2, 256 }
  0x30   :  { %p120_p7 = scmp.ne.s32.totalorder %s191_s2, %s119_s8  ;;  %p123_p8 = scmp.lt.u32.totalorder %s119_s8, %s191_s2 }
  0x32   :  { %p125_p9 = pnand %p123_p8, %p120_p7 }
  0x34   :  { %128 = shalt.err (!%p125_p9)
}
  0x35   :  { %53 = dma.vmem_to_hbm [thread:$0]  %s51_s5, 256, %s191_s2, [#allocation4]  }
  0x36   :  { %133 = dma.done.wait [#allocation4], 256  }
  0x37   :  { %134 = vsyncadd [#allocation4], 4294967040 }
  0x38   :  { %57 = vsyncpa [#allocation3], 1 }
  0x39   :  { %58 = vsyncpa [#allocation6], 1 }
  0x3a   :  { %59 = vsyncpa [#allocation4], 1 }

</bundles_post_ra>
